<compile_context>
chip_gen: v6e
topology: v6e:2x2x1
jax: 0.10.0
libtpu: 0.0.40
codegen_flags: <defaults>
</compile_context>

<pallas_src>
import functools

import jax
import jax.numpy as jnp
from jax import lax
from jax.experimental import pallas as pl
from jax.experimental.pallas import tpu as pltpu

_EPS = 1e-8
_EPS2 = _EPS * _EPS
_VMEM_LIMIT = 64 * 1024 * 1024          # scoped VMEM allowance (safe on v5e/v6e/v7x)
_INPUT_BUF_BUDGET = 24 << 20            # budget for 2 inputs x 2 pipeline buffers


def _round_up(x, m):
    return ((x + m - 1) // m) * m


# ---------------------------------------------------------------------------
# Kernel 1: outer-product (SimCSE) path — normalize rows, then MXU matmul.
# ---------------------------------------------------------------------------
def _outer_cos_kernel(x_ref, y_ref, o_ref, *, inv_temp):
    x = x_ref[...].astype(jnp.float32)                      # (tm, H)
    y = y_ref[...].astype(jnp.float32)                      # (tn, H)
    xn = x * lax.rsqrt(jnp.maximum(jnp.sum(x * x, axis=-1, keepdims=True), _EPS2))
    yn = y * lax.rsqrt(jnp.maximum(jnp.sum(y * y, axis=-1, keepdims=True), _EPS2))
    # Contract the feature dim on the MXU -> (tm, tn), lane-dense output.
    sim = lax.dot_general(xn, yn, (((1,), (1,)), ((), ())),
                          preferred_element_type=jnp.float32)
    o_ref[...] = (sim * inv_temp).astype(o_ref.dtype)


def _similarity_outer(x2d, y2d, temp, out_dtype):
    bx, h = x2d.shape
    by, _ = y2d.shape
    itemsize = max(x2d.dtype.itemsize, y2d.dtype.itemsize)

    single_block = (bx * h * itemsize + by * h * itemsize + bx * by * 4) <= (16 << 20)
    if single_block:
        tm, tn = bx, by                                      # blocks == full arrays
    else:
        tm = min(256, _round_up(bx, 8))
        tn = max(128, min(256, _round_up(by, 128)))
        if bx % tm:
            x2d = jnp.pad(x2d, ((0, _round_up(bx, tm) - bx), (0, 0)))
        if by % tn:
            y2d = jnp.pad(y2d, ((0, _round_up(by, tn) - by), (0, 0)))

    bxp, byp = x2d.shape[0], y2d.shape[0]
    kernel = functools.partial(_outer_cos_kernel, inv_temp=1.0 / float(temp))

    out = pl.pallas_call(
        kernel,
        out_shape=jax.ShapeDtypeStruct((bxp, byp), out_dtype),
        grid_spec=pltpu.PrefetchScalarGridSpec(
            num_scalar_prefetch=0,
            grid=(bxp // tm, byp // tn),
            in_specs=[
                pl.BlockSpec((tm, h), lambda i, j: (i, 0)),
                pl.BlockSpec((tn, h), lambda i, j: (j, 0)),
            ],
            out_specs=pl.BlockSpec((tm, tn), lambda i, j: (i, j)),
        ),
        compiler_params=pltpu.CompilerParams(
            dimension_semantics=("parallel", "parallel"),
            vmem_limit_bytes=_VMEM_LIMIT,
        ),
    )(x2d, y2d)
    return out[:bx, :by]


# ---------------------------------------------------------------------------
# Kernel 2: general row-wise path — large row tiles, lane-dense output.
# ---------------------------------------------------------------------------
def _rowwise_cos_kernel(x_ref, y_ref, o_ref, *, inv_temp):
    x = x_ref[...].astype(jnp.float32)                       # (tile_r, H)
    y = y_ref[...].astype(jnp.float32)
    dot = jnp.sum(x * y, axis=-1, keepdims=True)             # (tile_r, 1)
    inv_nx = lax.rsqrt(jnp.maximum(jnp.sum(x * x, axis=-1, keepdims=True), _EPS2))
    inv_ny = lax.rsqrt(jnp.maximum(jnp.sum(y * y, axis=-1, keepdims=True), _EPS2))
    cos = dot * inv_nx * inv_ny                              # (tile_r, 1)
    tile_r = cos.shape[0]
    # Lane-dense store: (tile_r, 1) -> (1, tile_r) (cheap XLU relayout) so the
    # output uses unmasked full-lane vst instead of 1-of-128 masked stores.
    o_ref[...] = (cos.reshape(1, tile_r) * inv_temp).astype(o_ref.dtype)


def _similarity_rowwise(xb, yb, temp, out_dtype, lead_shape):
    r, h = xb.shape
    bytes_per_row = (xb.dtype.itemsize + yb.dtype.itemsize) * h

    # Tile size: largest multiple of 128 (lane-dense output, also satisfies the
    # bf16 (16,128) sublane minimum) such that 2 inputs x 2 pipeline buffers
    # fit the VMEM budget; capped at 2048 rows; no bigger than needed.
    max_by_vmem = max(128, ((_INPUT_BUF_BUDGET // (2 * bytes_per_row)) // 128) * 128)
    tile_r = min(2048, max_by_vmem, _round_up(r, 128))

    r_pad = _round_up(r, tile_r)
    if r_pad != r:
        pad = ((0, r_pad - r), (0, 0))
        xb = jnp.pad(xb, pad)
        yb = jnp.pad(yb, pad)
    num_tiles = r_pad // tile_r

    kernel = functools.partial(_rowwise_cos_kernel, inv_temp=1.0 / float(temp))

    out = pl.pallas_call(
        kernel,
        out_shape=jax.ShapeDtypeStruct((num_tiles, tile_r), out_dtype),
        grid_spec=pltpu.PrefetchScalarGridSpec(
            num_scalar_prefetch=0,
            grid=(num_tiles,),
            in_specs=[
                pl.BlockSpec((tile_r, h), lambda i: (i, 0)),
                pl.BlockSpec((tile_r, h), lambda i: (i, 0)),
            ],
            out_specs=pl.BlockSpec((1, tile_r), lambda i: (i, 0)),
        ),
        compiler_params=pltpu.CompilerParams(
            dimension_semantics=("parallel",),
            vmem_limit_bytes=_VMEM_LIMIT,
        ),
    )(xb, yb)
    return out.reshape(-1)[:r].reshape(lead_shape)


# ---------------------------------------------------------------------------
# Public wrapper (Similarity.forward)
# ---------------------------------------------------------------------------
def similarity(x, y, temp):
    """Pallas implementation of Similarity.forward(x, y) = cos(x, y) / temp."""
    x = jnp.asarray(x)
    y = jnp.asarray(y)
    assert x.shape[-1] == y.shape[-1], "last (feature) dims must match"
    h = x.shape[-1]
    out_dtype = jnp.result_type(x.dtype, y.dtype)
    if not jnp.issubdtype(out_dtype, jnp.floating):
        out_dtype = jnp.float32

    # SimCSE pattern: x.unsqueeze(1) vs y.unsqueeze(0) -> outer product of rows.
    # Use the normalize-then-MXU-matmul kernel instead of materializing the
    # (Bx*By, H) broadcast in HBM.
    if x.ndim == 3 and y.ndim == 3 and x.shape[1] == 1 and y.shape[0] == 1:
        return _similarity_outer(x[:, 0, :], y[0, :, :], temp, out_dtype)

    # General path: broadcast leading dims, flatten to rows.
    lead_shape = jnp.broadcast_shapes(x.shape[:-1], y.shape[:-1])
    xb = jnp.broadcast_to(x, lead_shape + (h,)).reshape(-1, h)
    yb = jnp.broadcast_to(y, lead_shape + (h,)).reshape(-1, h)
    return _similarity_rowwise(xb, yb, temp, out_dtype, lead_shape)


def _reference(x, y, temp):
    """Pure-JAX reference mirroring torch CosineSimilarity(dim=-1) / temp."""
    x = x.astype(jnp.float32)
    y = y.astype(jnp.float32)
    dot = jnp.sum(x * y, axis=-1)
    nx = jnp.sqrt(jnp.sum(x * x, axis=-1))
    ny = jnp.sqrt(jnp.sum(y * y, axis=-1))
    return dot / (jnp.maximum(nx, _EPS) * jnp.maximum(ny, _EPS)) / temp


if __name__ == "__main__":
    key = jax.random.PRNGKey(0)
    kx, ky, ka, kb = jax.random.split(key, 4)
    temp = 0.05
    H = 32

    # 1) SimCSE usage: x.unsqueeze(1) vs y.unsqueeze(0) -> (B, B) sim matrix
    #    (exercises the MXU outer-product kernel).
    B = 8
    x = jax.random.normal(kx, (B, 1, H), dtype=jnp.float32)
    y = jax.random.normal(ky, (1, B, H), dtype=jnp.float32)
    out = jax.block_until_ready(similarity(x, y, temp))
    ref = _reference(x, y, temp)
    assert out.shape == (B, B), out.shape
    assert jnp.allclose(out, ref, atol=1e-3, rtol=1e-3), (
        float(jnp.max(jnp.abs(out - ref)))
    )

    # 2) General broadcast usage (exercises the row-wise kernel).
    a = jax.random.normal(ka, (4, 8, H), dtype=jnp.float32)
    b = jax.random.normal(kb, (1, 8, H), dtype=jnp.float32)
    out2 = jax.block_until_ready(similarity(a, b, temp))
    ref2 = _reference(a, b, temp)
    assert out2.shape == (4, 8), out2.shape
    assert jnp.allclose(out2, ref2, atol=1e-3, rtol=1e-3), (
        float(jnp.max(jnp.abs(out2 - ref2)))
    )

    print("KERNEL_OK")
</pallas_src>

<mosaic_0001>
module attributes {stable_mosaic.version = 11 : i64} {
  func.func @_outer_cos_kernel(%arg0: i32, %arg1: i32, %arg2: memref<8x32xf32, #tpu.memory_space<vmem>>, %arg3: memref<8x32xf32, #tpu.memory_space<vmem>>, %arg4: memref<8x8xf32, #tpu.memory_space<vmem>>) attributes {dimension_semantics = [#tpu.dimension_semantics<parallel>, #tpu.dimension_semantics<parallel>], iteration_bounds = array<i64: 1, 1>, scalar_prefetch = 0 : i64, scratch_operands = 0 : i64, tpu.core_type = #tpu.core_type<tc>, window_params = [{transform_indices = @transform_0, window_bounds = array<i64: 8, 32>}, {transform_indices = @transform_1, window_bounds = array<i64: 8, 32>}, {transform_indices = @transform_2, window_bounds = array<i64: 8, 8>}]} {
    %c0 = arith.constant 0 : index
    %c0_0 = arith.constant 0 : index
    %0 = vector.load %arg2[%c0, %c0_0] : memref<8x32xf32, #tpu.memory_space<vmem>>, vector<8x32xf32>
    %c0_1 = arith.constant 0 : index
    %c0_2 = arith.constant 0 : index
    %1 = vector.load %arg3[%c0_1, %c0_2] : memref<8x32xf32, #tpu.memory_space<vmem>>, vector<8x32xf32>
    %2 = arith.mulf %0, %0 : vector<8x32xf32>
    %cst = arith.constant dense<0.000000e+00> : vector<8xf32>
    %3 = vector.multi_reduction <add>, %2, %cst [1] : vector<8x32xf32> to vector<8xf32>
    %4 = vector.shape_cast %3 : vector<8xf32> to vector<8x1xf32>
    %cst_3 = arith.constant 1.000000e-16 : f32
    %5 = vector.broadcast %cst_3 : f32 to vector<8x1xf32>
    %6 = arith.maximumf %4, %5 : vector<8x1xf32>
    %7 = math.rsqrt %6 : vector<8x1xf32>
    %8 = vector.broadcast %7 : vector<8x1xf32> to vector<8x32xf32>
    %9 = arith.mulf %0, %8 : vector<8x32xf32>
    %10 = arith.mulf %1, %1 : vector<8x32xf32>
    %cst_4 = arith.constant dense<0.000000e+00> : vector<8xf32>
    %11 = vector.multi_reduction <add>, %10, %cst_4 [1] : vector<8x32xf32> to vector<8xf32>
    %12 = vector.shape_cast %11 : vector<8xf32> to vector<8x1xf32>
    %cst_5 = arith.constant 1.000000e-16 : f32
    %13 = vector.broadcast %cst_5 : f32 to vector<8x1xf32>
    %14 = arith.maximumf %12, %13 : vector<8x1xf32>
    %15 = math.rsqrt %14 : vector<8x1xf32>
    %16 = vector.broadcast %15 : vector<8x1xf32> to vector<8x32xf32>
    %17 = arith.mulf %1, %16 : vector<8x32xf32>
    %cst_6 = arith.constant dense<0.000000e+00> : vector<8x8xf32>
    %18 = tpu.matmul %9, %17, %cst_6 {dimension_numbers = #tpu.dot_dimension_numbers<[1], [1], [0], [0], [0, 0, 1, 0], [], []>} : vector<8x32xf32>, vector<8x32xf32>, vector<8x8xf32> -> vector<8x8xf32>
    %cst_7 = arith.constant 2.000000e+01 : f32
    %19 = vector.broadcast %cst_7 : f32 to vector<8x8xf32>
    %20 = arith.mulf %18, %19 : vector<8x8xf32>
    %c0_8 = arith.constant 0 : index
    %c0_9 = arith.constant 0 : index
    %21 = vector.load %arg4[%c0_8, %c0_9] : memref<8x8xf32, #tpu.memory_space<vmem>>, vector<8x8xf32>
    tpu.vector_store %arg4[%c0_8, %c0_9], %20 {strides = array<i32>} : memref<8x8xf32, #tpu.memory_space<vmem>>, vector<8x8xf32>,
    return
  }
  func.func @transform_0(%arg0: i32, %arg1: i32) -> (i32, i32) {
    %c0_i32 = arith.constant 0 : i32
    %c0_i32_0 = arith.constant 0 : i32
    return %arg0, %c0_i32 : i32, i32
  }
  func.func @transform_1(%arg0: i32, %arg1: i32) -> (i32, i32) {
    %c0_i32 = arith.constant 0 : i32
    %c0_i32_0 = arith.constant 0 : i32
    return %arg1, %c0_i32 : i32, i32
  }
  func.func @transform_2(%arg0: i32, %arg1: i32) -> (i32, i32) {
    %c0_i32 = arith.constant 0 : i32
    return %arg0, %arg1 : i32, i32
  }
}

</mosaic_0001>

<bundles_post_ra>
// kernel: tpu_custom_call.1
= control target key start
LH: loop header
LB: loop body
LE: loop exit
PB: predicated region body
PF: predicated region fallthrough
CT: control target
= control target key end

     0   :  { %7 = vsyncpa [#allocation3], 0  ;;  %s265_s0 = inlined_call_operand.hbm [shape: f32[8,32], index: 0, kind: input, shape index: {}]   ;;  %s266_s1 = inlined_call_operand.hbm [shape: f32[8,32], index: 1, kind: input, shape index: {}]   ;;  %s267_s2 = inlined_call_operand.hbm [shape: f32[8,8], index: 2, kind: output, shape index: {}]  }
   0x1   :  { %8 = vsyncpa [#allocation6], 0 }
   0x2   :  { %9 = vsyncpa [#allocation4], 0  ;;  %s232_s9 = smov [#allocation2]   ;;  %s233_s11 = smov [#allocation5]  }
   0x3   :  { %s16_s10 = sshll.u32 %s232_s9, 4  ;;  %s26_s12 = sshll.u32 %s233_s11, 4  ;;  %s17_s10 = int_to_ptr.vmem [resolvable:$true] %s16_s10  ;;  %s27_s12 = int_to_ptr.vmem [resolvable:$true] %s26_s12 }
   0x4   :  { %s174_s13 = scalar_lea.vmem %s17_s10, 128  ;;  %p179_p1 = scmp.lt.s32.totalorder %s17_s10, %s17_s10 }
   0x5   :  { %p175_p0 = scmp.ne.s32.totalorder %s17_s10, %s174_s13  ;;  %p180_p2 = scmp.lt.s32.totalorder %s174_s13, %s174_s13 }
   0x7   :  { %p181_p3 = por %p180_p2, %p179_p1 }
   0x9   :  { %p182_p4 = pnand %p181_p3, %p175_p0 }
   0xb   :  { %185 = shalt.err (!%p182_p4)
}
   0xc   :  { %19 = dma.hbm_to_vmem [thread:$0]  %s265_s0, 128, %s17_s10, [#allocation3]  }
   0xd   :  { %s194_s16 = scalar_lea.vmem %s27_s12, 128  ;;  %p199_p6 = scmp.lt.s32.totalorder %s27_s12, %s27_s12 }
   0xe   :  { %p195_p5 = scmp.ne.s32.totalorder %s27_s12, %s194_s16  ;;  %p200_p7 = scmp.lt.s32.totalorder %s194_s16, %s194_s16 }
  0x10   :  { %p201_p8 = por %p200_p7, %p199_p6 }
  0x12   :  { %p202_p9 = pnand %p201_p8, %p195_p5 }
  0x14   :  { %205 = shalt.err (!%p202_p9)
}
  0x15   :  { %29 = dma.hbm_to_vmem [thread:$0]  %s266_s1, 128, %s27_s12, [#allocation6]  }
  0x16   :  { %226 = dma.done.wait [#allocation3], 128  }
  0x17   :  { %227 = vsyncadd [#allocation3], 4294967168 }
  0x18   :  { %228 = dma.done.wait [#allocation6], 128  }
  0x19   :  { %229 = vsyncadd [#allocation6], 4294967168  ;;  %v37_v0 = vld [vmem:[#allocation5] sm:$0xff]  ;;  %vm39_vm0 = vcmask 261120   ;;  %v36_v1 = vld [vmem:[#allocation2] sm:$0xff]  ;;  %v234_v6 = vmov 0.0  }
  0x1a   :  { %v46_v2 = vmul.f32 %v37_v0, %v37_v0  ;;  %v38_v3 = vmul.f32 %v36_v1, %v36_v1  ;;  %152 = vmatprep.subr.mxu0 %v234_v6  ;;  %vm235_vm1 = vmmov 0   ;;  %s236_s0 = smov [#allocation7]   ;;  %vm130_vm2 = vcmask 64512  }
  0x1b   :  { %154 = vmatprep.mubr.msk.f32.mxu0 %vm235_vm1, %v234_v6  ;;  %s138_s1 = sshll.u32 %s236_s0, 4  ;;  %s139_s1 = int_to_ptr.vmem [resolvable:$true] %s138_s1 }
  0x1c   :  { %v47_v4 = vsel %vm39_vm0, %v46_v2, 0.0  ;;  %v40_v5 = vsel %vm39_vm0, %v38_v3, 0.0  ;;  %s206_s19 = scalar_lea.vmem %s139_s1, 128  ;;  %p211_p11 = scmp.lt.s32.totalorder %s139_s1, %s139_s1 }
  0x1d   :  { %48 = vadd.xlane.f32.xlu0 %v47_v4  ;;  %p207_p10 = scmp.ne.s32.totalorder %s139_s1, %s206_s19  ;;  %p212_p12 = scmp.lt.s32.totalorder %s206_s19, %s206_s19 }
  0x1f   :  { %p213_p13 = por %p212_p12, %p211_p11 }
  0x21   :  { %41 = vadd.xlane.f32.xlu0 %v40_v5  ;;  %p214_p0 = pnand %p213_p13, %p207_p10 }
  0xa6   :  { %v49_v7 = vpop.xlane.xlu0 %48 }
  0xa7   :  { %v50_v8 = vmax.f32 %v49_v7, 1e-16 }
  0xa9   :  { %162 = vrsqrt.f32 %v50_v8 }
  0xaa   :  { %v42_v9 = vpop.xlane.xlu0 %41 }
  0xab   :  { %v43_v10 = vmax.f32 %v42_v9, 1e-16 }
  0xad   :  { %164 = vrsqrt.f32 %v43_v10 }
  0xb6   :  { %v163_v11 = vpop.eup %162 }
  0xb7   :  { %v52_v12 = vmul.f32 %v163_v11, %v37_v0 }
  0xb9   :  { %153 = vmatpush3.xpose.msk.msra.mxu0 %vm39_vm0, %v52_v12 }
  0xba   :  { %v165_v13 = vpop.eup %164 }
  0xbb   :  { %v45_v14 = vmul.f32 %v165_v13, %v36_v1 }
  0xbd   :  { %155 = vmatmul.mubr.msk.f32.vlgmr.msra.gmra.mxu0 %vm39_vm0, %v45_v14 }
 0x17d   :  { %v125_v15 = vpop.f32.mrf.mxu0 }
 0x17e   :  { %v129_v16 = vmul.f32 20.0, %v125_v15 }
 0x17f   :  { %v156_v17 = vpop.f32.mrf.mxu0 }
 0x180   :  { %131 = vst.msk [vmem:[#allocation7] sm:$0xff] %vm130_vm2, %v129_v16 }
 0x181   :  { %217 = shalt.err (!%p214_p0)
}
 0x182   :  { %141 = dma.vmem_to_hbm [thread:$0]  %s139_s1, 128, %s267_s2, [#allocation4]  }
 0x183   :  { %230 = dma.done.wait [#allocation4], 128  }
 0x184   :  { %231 = vsyncadd [#allocation4], 4294967168 }
 0x185   :  { %145 = vsyncpa [#allocation3], 1 }
 0x186   :  { %146 = vsyncpa [#allocation6], 1 }
 0x187   :  { %147 = vsyncpa [#allocation4], 1 }

</bundles_post_ra>
